<compile_context>
chip_gen: v6e
topology: v6e:2x2x1
jax: 0.10.0
libtpu: 0.0.40
codegen_flags: <defaults>
</compile_context>

<pallas_src>
import functools

import jax
import jax.numpy as jnp
from jax.experimental import pallas as pl
from jax.experimental.pallas import tpu as pltpu

# ---- model hyperparameters (small, consistent with the module) ----
N_LAYER = 2
HIDDEN_DIM = 32
OUTPUT_DIM = 16
BATCH = 2
SEQ = 8

_LANE = 128
_SUBLANE = 8
_MAX_TM = 512  # row-tile cap; 512-row tiles already reach ~85% of HBM roofline


def _round_up(a, b):
    return ((a + b - 1) // b) * b


def mlp_kernel(x_ref, wh_ref, bh_ref, wo_ref, bo_ref, o_ref, *, n_layer):
    """One row-tile of the MLP: n_layer x (Linear+ReLU), then output Linear.

    x_ref:  (TM, H)         bf16, blocked over rows (streamed / pipelined)
    wh_ref: (n_layer, H, H) bf16, VMEM-resident
    bh_ref: (n_layer, 1, H) f32,  VMEM-resident
    wo_ref: (H, O_PAD)      bf16, VMEM-resident (zero-padded to 128 lanes)
    bo_ref: (1, O_PAD)      f32,  VMEM-resident (zero-padded)
    o_ref:  (TM, O_PAD)     f32 lane-dense output slab
    """
    h = x_ref[...]                                            # bf16 (TM, H)
    for l in range(n_layer):                                  # static unroll
        acc = jnp.dot(h, wh_ref[l], preferred_element_type=jnp.float32)  # MXU, f32 acc
        acc = jnp.maximum(acc + bh_ref[l], 0.0)               # bias + ReLU in f32 (VPU)
        h = acc.astype(jnp.bfloat16)                          # bf16 operand for next MXU op
    # dropout is identity at inference time (no RNG / no masking applied)
    out = jnp.dot(h, wo_ref[...], preferred_element_type=jnp.float32) + bo_ref[...]
    o_ref[...] = out.astype(o_ref.dtype)                      # full 128-lane unmasked store


def mlp_forward(x, w_hidden, b_hidden, w_out, b_out):
    """x: (B, S, H) float32. Returns (B, S, O) float32."""
    B, S, H = x.shape
    n_layer = w_hidden.shape[0]
    O = w_out.shape[1]
    N = B * S

    # --- row tiling: one big tile for small N, 512-row tiles otherwise ---
    TM = min(_MAX_TM, _round_up(N, _SUBLANE))
    N_pad = _round_up(N, TM)                                  # cdiv-safe tail handling
    grid = (N_pad // TM,)
    # NOTE(v7x): with 2 TensorCores, prefer an even number of grid steps when
    # N_pad // TM > 1 so dimension_semantics=("parallel",) balances both cores.

    # --- lane-dense output slab: pad O (and W_out / b_out columns) to 128 ---
    O_pad = _round_up(O, _LANE)

    # --- cast matmul operands to bf16; biases stay f32 for the VPU path ---
    x2 = x.reshape(N, H)
    if N_pad != N:
        x2 = jnp.pad(x2, ((0, N_pad - N), (0, 0)))
    x2 = x2.astype(jnp.bfloat16)
    wh = w_hidden.astype(jnp.bfloat16)                        # (n_layer, H, H)
    bh = b_hidden.astype(jnp.float32)                         # (n_layer, 1, H)
    wo = jnp.pad(w_out, ((0, 0), (0, O_pad - O))).astype(jnp.bfloat16)
    bo = jnp.pad(b_out, ((0, 0), (0, O_pad - O))).astype(jnp.float32)

    flops = 2 * N_pad * (n_layer * H * H + H * O_pad)
    bytes_accessed = (x2.size * 2 + wh.size * 2 + bh.size * 4 +
                      wo.size * 2 + bo.size * 4 + N_pad * O_pad * 4)

    kernel = functools.partial(mlp_kernel, n_layer=n_layer)
    resident = pl.BlockSpec(memory_space=pltpu.MemorySpace.VMEM)  # whole array, no pipelining

    out2 = pl.pallas_call(
        kernel,
        out_shape=jax.ShapeDtypeStruct((N_pad, O_pad), jnp.float32),
        grid=grid,
        in_specs=[
            pl.BlockSpec((TM, H), lambda i: (i, 0)),          # streamed x row tiles
            resident,                                         # w_hidden (bf16)
            resident,                                         # b_hidden (f32)
            resident,                                         # w_out    (bf16, padded)
            resident,                                         # b_out    (f32,  padded)
        ],
        out_specs=pl.BlockSpec((TM, O_pad), lambda i: (i, 0)),
        compiler_params=pltpu.CompilerParams(
            dimension_semantics=("parallel",),
            vmem_limit_bytes=32 << 20),                       # far above actual use; safe on v7x's 64 MiB
        cost_estimate=pl.CostEstimate(
            flops=flops, transcendentals=0, bytes_accessed=bytes_accessed),
    )(x2, wh, bh, wo, bo)

    return out2[:N, :O].reshape(B, S, O)


def init_params(key, n_layer, hidden_dim, output_dim):
    """Deterministic xavier-uniform-style init (matches Linear shapes)."""
    keys = jax.random.split(key, 2 * n_layer + 2)
    w_hidden, b_hidden = [], []
    for l in range(n_layer):
        limit = (6.0 / (hidden_dim + hidden_dim)) ** 0.5
        # stored as (in, out): equivalent to PyTorch Linear.weight (out,in) transposed
        w_hidden.append(jax.random.uniform(
            keys[2 * l], (hidden_dim, hidden_dim), jnp.float32, -limit, limit))
        b_hidden.append(jax.random.uniform(
            keys[2 * l + 1], (1, hidden_dim), jnp.float32, -0.1, 0.1))
    limit = (6.0 / (hidden_dim + output_dim)) ** 0.5
    w_out = jax.random.uniform(
        keys[-2], (hidden_dim, output_dim), jnp.float32, -limit, limit)
    b_out = jax.random.uniform(
        keys[-1], (1, output_dim), jnp.float32, -0.1, 0.1)
    return (jnp.stack(w_hidden), jnp.stack(b_hidden), w_out, b_out)


def mlp_reference(x, w_hidden, b_hidden, w_out, b_out, *, bf16_dots):
    """Pure-JAX reference.

    bf16_dots=True mimics the kernel's bf16 MXU operands with f32 accumulation;
    bf16_dots=False is the exact f32 math of the PyTorch module.
    """
    cast = (lambda a: a.astype(jnp.bfloat16)) if bf16_dots else (lambda a: a)
    h = cast(x)
    for l in range(w_hidden.shape[0]):
        acc = jnp.dot(h, cast(w_hidden[l]), preferred_element_type=jnp.float32)
        h = cast(jnp.maximum(acc + b_hidden[l], 0.0))
    return jnp.dot(h, cast(w_out), preferred_element_type=jnp.float32) + b_out


if __name__ == "__main__":
    key = jax.random.PRNGKey(0)
    kx, kp = jax.random.split(key)
    x = jax.random.normal(kx, (BATCH, SEQ, HIDDEN_DIM), dtype=jnp.float32)
    w_hidden, b_hidden, w_out, b_out = init_params(
        kp, N_LAYER, HIDDEN_DIM, OUTPUT_DIM)

    out = mlp_forward(x, w_hidden, b_hidden, w_out, b_out)
    out = jax.block_until_ready(out)
    assert out.shape == (BATCH, SEQ, OUTPUT_DIM)

    # Exact-semantics check: same bf16 operands / f32 accumulate as the kernel.
    ref_bf16 = mlp_reference(x, w_hidden, b_hidden, w_out, b_out, bf16_dots=True)
    assert jnp.allclose(out, ref_bf16, atol=1e-3, rtol=1e-3)

    # Sanity check vs the pure-f32 module math (bf16 operands cost ~1e-2 abs error).
    ref_f32 = mlp_reference(x, w_hidden, b_hidden, w_out, b_out, bf16_dots=False)
    assert jnp.max(jnp.abs(out - ref_f32)) < 0.1

    print("KERNEL_OK")
</pallas_src>

<mosaic_0001>
module attributes {stable_mosaic.version = 11 : i64} {
  func.func @mlp_kernel(%arg0: i32, %arg1: memref<16x32xbf16, #tpu.memory_space<vmem>>, %arg2: memref<2x32x32xbf16, #tpu.memory_space<vmem>>, %arg3: memref<2x1x32xf32, #tpu.memory_space<vmem>>, %arg4: memref<32x128xbf16, #tpu.memory_space<vmem>>, %arg5: memref<1x128xf32, #tpu.memory_space<vmem>>, %arg6: memref<16x128xf32, #tpu.memory_space<vmem>>) attributes {dimension_semantics = [#tpu.dimension_semantics<parallel>], iteration_bounds = array<i64: 1>, scalar_prefetch = 0 : i64, scratch_operands = 0 : i64, tpu.core_type = #tpu.core_type<tc>, window_params = [{transform_indices = @transform_0, window_bounds = array<i64: 16, 32>}, {pipeline_mode = #tpu.pipeline_mode<synchronous>, transform_indices = @transform_1, window_bounds = array<i64: 2, 32, 32>}, {pipeline_mode = #tpu.pipeline_mode<synchronous>, transform_indices = @transform_2, window_bounds = array<i64: 2, 1, 32>}, {pipeline_mode = #tpu.pipeline_mode<synchronous>, transform_indices = @transform_3, window_bounds = array<i64: 32, 128>}, {pipeline_mode = #tpu.pipeline_mode<synchronous>, transform_indices = @transform_4, window_bounds = array<i64: 1, 128>}, {transform_indices = @transform_5, window_bounds = array<i64: 16, 128>}]} {
    %c0 = arith.constant 0 : index
    %c0_0 = arith.constant 0 : index
    %0 = vector.load %arg1[%c0, %c0_0] : memref<16x32xbf16, #tpu.memory_space<vmem>>, vector<16x32xbf16>
    %c0_1 = arith.constant 0 : index
    %c0_2 = arith.constant 0 : index
    %c0_3 = arith.constant 0 : index
    %1 = vector.load %arg2[%c0_1, %c0_2, %c0_3] : memref<2x32x32xbf16, #tpu.memory_space<vmem>>, vector<1x32x32xbf16>
    %2 = vector.shape_cast %1 : vector<1x32x32xbf16> to vector<32x32xbf16>
    %cst = arith.constant dense<0.000000e+00> : vector<16x32xf32>
    %3 = tpu.matmul %0, %2, %cst {dimension_numbers = #tpu.dot_dimension_numbers<[1], [0], [0], [1], [0, 0, 1, 1], [], []>} : vector<16x32xbf16>, vector<32x32xbf16>, vector<16x32xf32> -> vector<16x32xf32>
    %c0_4 = arith.constant 0 : index
    %c0_5 = arith.constant 0 : index
    %c0_6 = arith.constant 0 : index
    %4 = vector.load %arg3[%c0_4, %c0_5, %c0_6] : memref<2x1x32xf32, #tpu.memory_space<vmem>>, vector<1x1x32xf32>
    %5 = vector.shape_cast %4 : vector<1x1x32xf32> to vector<1x32xf32>
    %6 = vector.broadcast %5 : vector<1x32xf32> to vector<16x32xf32>
    %7 = arith.addf %3, %6 : vector<16x32xf32>
    %cst_7 = arith.constant 0.000000e+00 : f32
    %8 = vector.broadcast %cst_7 : f32 to vector<16x32xf32>
    %9 = arith.maximumf %7, %8 : vector<16x32xf32>
    %10 = arith.truncf %9 : vector<16x32xf32> to vector<16x32xbf16>
    %c1 = arith.constant 1 : index
    %c0_8 = arith.constant 0 : index
    %c0_9 = arith.constant 0 : index
    %11 = vector.load %arg2[%c1, %c0_8, %c0_9] : memref<2x32x32xbf16, #tpu.memory_space<vmem>>, vector<1x32x32xbf16>
    %12 = vector.shape_cast %11 : vector<1x32x32xbf16> to vector<32x32xbf16>
    %cst_10 = arith.constant dense<0.000000e+00> : vector<16x32xf32>
    %13 = tpu.matmul %10, %12, %cst_10 {dimension_numbers = #tpu.dot_dimension_numbers<[1], [0], [0], [1], [0, 0, 1, 1], [], []>} : vector<16x32xbf16>, vector<32x32xbf16>, vector<16x32xf32> -> vector<16x32xf32>
    %c1_11 = arith.constant 1 : index
    %c0_12 = arith.constant 0 : index
    %c0_13 = arith.constant 0 : index
    %14 = vector.load %arg3[%c1_11, %c0_12, %c0_13] : memref<2x1x32xf32, #tpu.memory_space<vmem>>, vector<1x1x32xf32>
    %15 = vector.shape_cast %14 : vector<1x1x32xf32> to vector<1x32xf32>
    %16 = vector.broadcast %15 : vector<1x32xf32> to vector<16x32xf32>
    %17 = arith.addf %13, %16 : vector<16x32xf32>
    %cst_14 = arith.constant 0.000000e+00 : f32
    %18 = vector.broadcast %cst_14 : f32 to vector<16x32xf32>
    %19 = arith.maximumf %17, %18 : vector<16x32xf32>
    %20 = arith.truncf %19 : vector<16x32xf32> to vector<16x32xbf16>
    %c0_15 = arith.constant 0 : index
    %c0_16 = arith.constant 0 : index
    %21 = vector.load %arg4[%c0_15, %c0_16] : memref<32x128xbf16, #tpu.memory_space<vmem>>, vector<32x128xbf16>
    %cst_17 = arith.constant dense<0.000000e+00> : vector<16x128xf32>
    %22 = tpu.matmul %20, %21, %cst_17 {dimension_numbers = #tpu.dot_dimension_numbers<[1], [0], [0], [1], [0, 0, 1, 1], [], []>} : vector<16x32xbf16>, vector<32x128xbf16>, vector<16x128xf32> -> vector<16x128xf32>
    %c0_18 = arith.constant 0 : index
    %c0_19 = arith.constant 0 : index
    %23 = vector.load %arg5[%c0_18, %c0_19] : memref<1x128xf32, #tpu.memory_space<vmem>>, vector<1x128xf32>
    %24 = vector.broadcast %23 : vector<1x128xf32> to vector<16x128xf32>
    %25 = arith.addf %22, %24 : vector<16x128xf32>
    %c0_20 = arith.constant 0 : index
    %c0_21 = arith.constant 0 : index
    %26 = vector.load %arg6[%c0_20, %c0_21] : memref<16x128xf32, #tpu.memory_space<vmem>>, vector<16x128xf32>
    tpu.vector_store %arg6[%c0_20, %c0_21], %25 {strides = array<i32>} : memref<16x128xf32, #tpu.memory_space<vmem>>, vector<16x128xf32>,
    return
  }
  func.func @transform_0(%arg0: i32) -> (i32, i32) {
    %c0_i32 = arith.constant 0 : i32
    %c0_i32_0 = arith.constant 0 : i32
    return %arg0, %c0_i32 : i32, i32
  }
  func.func @transform_1(%arg0: i32) -> (i32, i32, i32) {
    %c0_i32 = arith.constant 0 : i32
    %c0_i32_0 = arith.constant 0 : i32
    %c0_i32_1 = arith.constant 0 : i32
    %c0_i32_2 = arith.constant 0 : i32
    return %c0_i32, %c0_i32_0, %c0_i32_1 : i32, i32, i32
  }
  func.func @transform_2(%arg0: i32) -> (i32, i32, i32) {
    %c0_i32 = arith.constant 0 : i32
    %c0_i32_0 = arith.constant 0 : i32
    %c0_i32_1 = arith.constant 0 : i32
    %c0_i32_2 = arith.constant 0 : i32
    return %c0_i32, %c0_i32_0, %c0_i32_1 : i32, i32, i32
  }
  func.func @transform_3(%arg0: i32) -> (i32, i32) {
    %c0_i32 = arith.constant 0 : i32
    %c0_i32_0 = arith.constant 0 : i32
    %c0_i32_1 = arith.constant 0 : i32
    return %c0_i32, %c0_i32_0 : i32, i32
  }
  func.func @transform_4(%arg0: i32) -> (i32, i32) {
    %c0_i32 = arith.constant 0 : i32
    %c0_i32_0 = arith.constant 0 : i32
    %c0_i32_1 = arith.constant 0 : i32
    return %c0_i32, %c0_i32_0 : i32, i32
  }
  func.func @transform_5(%arg0: i32) -> (i32, i32) {
    %c0_i32 = arith.constant 0 : i32
    %c0_i32_0 = arith.constant 0 : i32
    return %arg0, %c0_i32 : i32, i32
  }
}

</mosaic_0001>

<bundles_post_ra>
// kernel: tpu_custom_call.1
= control target key start
LH: loop header
LB: loop body
LE: loop exit
PB: predicated region body
PF: predicated region fallthrough
CT: control target
= control target key end

     0   :  { %10 = vsyncpa [#allocation3], 0  ;;  %s514_s0 = inlined_call_operand.hbm [shape: bf16[16,32], index: 0, kind: input, shape index: {}]   ;;  %s515_s1 = inlined_call_operand.hbm [shape: bf16[2,32,32], index: 1, kind: input, shape index: {}]   ;;  %s516_s2 = inlined_call_operand.vmem [shape: f32[2,1,32], index: 2, kind: input, shape index: {}]   ;;  %s517_s3 = inlined_call_operand.hbm [shape: bf16[32,128], index: 3, kind: input, shape index: {}]   ;;  %s518_s4 = inlined_call_operand.vmem [shape: f32[1,128], index: 4, kind: input, shape index: {}]   ;;  %s519_s5 = inlined_call_operand.hbm [shape: f32[16,128], index: 5, kind: output, shape index: {}]  }
   0x1   :  { %11 = vsyncpa [#allocation6], 0 }
   0x2   :  { %12 = vsyncpa [#allocation4], 0  ;;  %s450_s18 = smov [#allocation5]   ;;  %s451_s20 = smov [#allocation2]  }
   0x3   :  { %s30_s19 = sshll.u32 %s450_s18, 4  ;;  %s18_s21 = sshll.u32 %s451_s20, 4  ;;  %s31_s19 = int_to_ptr.vmem [resolvable:$true] %s30_s19  ;;  %s19_s21 = int_to_ptr.vmem [resolvable:$true] %s18_s21 }
   0x4   :  { %s372_s22 = scalar_lea.vmem %s31_s19, 512  ;;  %p377_p1 = scmp.lt.s32.totalorder %s31_s19, %s31_s19 }
   0x5   :  { %p373_p0 = scmp.ne.s32.totalorder %s31_s19, %s372_s22  ;;  %p378_p2 = scmp.lt.s32.totalorder %s372_s22, %s372_s22 }
   0x7   :  { %p379_p3 = por %p378_p2, %p377_p1 }
   0x9   :  { %p380_p4 = pnand %p379_p3, %p373_p0 }
   0xb   :  { %383 = shalt.err (!%p380_p4)
}
   0xc   :  { %s452_s23 = smov 64   ;;  %s453_s24 = smov 4  }
   0xd   :  { %36 = dma.hbm_to_vmem [thread:$0]  %s515_s1, 512, %s31_s19, [#allocation6], %s452_s23, %s452_s23, %s453_s24  }
   0xe   :  { %s392_s27 = scalar_lea.vmem %s19_s21, 128  ;;  %p397_p6 = scmp.lt.s32.totalorder %s19_s21, %s19_s21 }
   0xf   :  { %p393_p5 = scmp.ne.s32.totalorder %s19_s21, %s392_s27  ;;  %p398_p7 = scmp.lt.s32.totalorder %s392_s27, %s392_s27 }
  0x11   :  { %p399_p8 = por %p398_p7, %p397_p6 }
  0x13   :  { %p400_p9 = pnand %p399_p8, %p393_p5 }
  0x15   :  { %403 = shalt.err (!%p400_p9)
}
  0x16   :  { %24 = dma.hbm_to_vmem [thread:$0]  %s514_s0, 128, %s19_s21, [#allocation3], %s452_s23, %s452_s23, %s453_s24  }
  0x17   :  { %s454_s30 = smov [#allocation7]  }
  0x18   :  { %s44_s6 = sshll.u32 %s454_s30, 4  ;;  %s45_s6 = int_to_ptr.vmem [resolvable:$true] %s44_s6 }
  0x19   :  { %s412_s7 = scalar_lea.vmem %s45_s6, 256  ;;  %p417_p11 = scmp.lt.s32.totalorder %s45_s6, %s45_s6 }
  0x1a   :  { %p413_p10 = scmp.ne.s32.totalorder %s45_s6, %s412_s7  ;;  %p418_p12 = scmp.lt.s32.totalorder %s412_s7, %s412_s7 }
  0x1c   :  { %p419_p13 = por %p418_p12, %p417_p11 }
  0x1e   :  { %p420_p0 = pnand %p419_p13, %p413_p10 }
  0x20   :  { %423 = shalt.err (!%p420_p0)
}
  0x21   :  { %50 = dma.hbm_to_vmem [thread:$0]  %s517_s3, 256, %s45_s6, [#allocation6], %s452_s23, %s452_s23, %s453_s24  }
  0x22   :  { %444 = dma.done.wait [#allocation3], 128  }
  0x23   :  { %445 = vsyncadd [#allocation3], 4294967168 }
  0x24   :  { %446 = dma.done.wait [#allocation6], 768  }
  0x25   :  { %447 = vsyncadd [#allocation6], 4294966528  ;;  %v455_v0 = vmov 0.0   ;;  %vm456_vm0 = vmmov 0   ;;  %v357_v1 = vld [vmem:[#allocation5 + $0x8] sm:$0xff]   ;;  %v358_v2 = vld [vmem:[#allocation5] sm:$0xff]  }
  0x26   :  { %323 = vmatprep.subr.bf16.mxu0 %v455_v0  ;;  %327 = vmatprep.mubr.msk.bf16.mxu0 %vm456_vm0, %v455_v0  ;;  %v359_v3 = vld [vmem:[#allocation2] sm:$0xff]   ;;  %vm93_vm1 = vcmask 261120   ;;  %v361_v5 = vld [vmem:[#allocation5 + $0x10] sm:$0xff]   ;;  %v362_v16 = vld [vmem:[#allocation7 + $0x8] sm:$0xff]   ;;  %s457_s13 = smov [#allocation8]  }
  0x27   :  { %331 = vmatprep.subr.bf16.mxu1 %v455_v0  ;;  %335 = vmatprep.mubr.msk.bf16.mxu1 %vm456_vm0, %v455_v0  ;;  %v360_v4 = vld [vmem:[#allocation5 + $0x18] sm:$0xff]   ;;  %v363_v17 = vld [vmem:[#allocation7] sm:$0xff]   ;;  %s287_s14 = sshll.u32 %s457_s13, 4  ;;  %s288_s14 = int_to_ptr.vmem [resolvable:$true] %s287_s14 }
  0x28   :  { %324 = vmatpush3.bf16.msra.mxu0 %v357_v1  ;;  %332 = vmatpush3.bf16.msra.mxu1 %v360_v4  ;;  %v300_v6 = vld [vmem:[%s516_s2] ss:$0 sm:$0xff]  ;;  %v306_v18 = vld [vmem:[%s516_s2 + $0x1] ss:$0 sm:$0xff]  ;;  %s424_s2 = scalar_lea.vmem %s288_s14, 256  ;;  %p429_p2 = scmp.lt.s32.totalorder %s288_s14, %s288_s14 }
  0x29   :  { %325 = vmatprep.subr.bf16.mxu0 %v455_v0  ;;  %333 = vmatprep.subr.bf16.mxu1 %v455_v0  ;;  %v310_v28 = vld [vmem:[%s518_s4] ss:$0 sm:$0xff]  ;;  %p425_p1 = scmp.ne.s32.totalorder %s288_s14, %s424_s2  ;;  %p430_p3 = scmp.lt.s32.totalorder %s424_s2, %s424_s2 }
  0x2b   :  { %p431_p4 = por %p430_p3, %p429_p2 }
  0x2c   :  { %326 = vmatpush3.bf16.msra.mxu0 %v358_v2  ;;  %334 = vmatpush3.bf16.msra.mxu1 %v361_v5 }
  0x2d   :  { %339 = vmatprep.subr.bf16.mxu0 %v455_v0  ;;  %p432_p5 = pnand %p431_p4, %p425_p1 }
  0x2f   :  { %328 = vmatmul.mubr.msk.bf16.vlgmr.msra.gmra.mxu0 %vm93_vm1, %v359_v3 }
  0x30   :  { %343 = vmatprep.mubr.msk.bf16.mxu0 %vm456_vm0, %v455_v0  ;;  %340 = vmatpush3.bf16.msra.mxu0 %v362_v16 }
  0x31   :  { %341 = vmatprep.subr.bf16.mxu0 %v455_v0 }
  0x34   :  { %342 = vmatpush3.bf16.msra.mxu0 %v363_v17 }
  0xef   :  { %v131_v7 = vpop.f32.mrf.mxu0 }
  0xf0   :  { %v132_v9 = vadd.f32 %v300_v6, %v131_v7 }
  0xf1   :  { %v329_v8 = vpop.f32.mrf.mxu0 }
  0xf2   :  { %v138_v13 = vmax.f32 %v132_v9, 0.0 }
  0xf3   :  { %v134_v10 = vpop.f32.mrf.mxu0 }
  0xf4   :  { %v135_v11 = vadd.f32 %v300_v6, %v134_v10 }
  0xf5   :  { %v330_v12 = vpop.f32.mrf.mxu0 }
  0xf6   :  { %v139_v14 = vmax.f32 %v135_v11, 0.0 }
  0xf8   :  { %v140_v15 = vpack.c.bf16 %v139_v14, %v138_v13 }
  0xfa   :  { %336 = vmatmul.mubr.msk.bf16.vlgmr.msra.gmra.mxu1 %vm93_vm1, %v140_v15 }
 0x1ba   :  { %v203_v19 = vpop.f32.mrf.mxu1 }
 0x1bb   :  { %v204_v21 = vadd.f32 %v306_v18, %v203_v19 }
 0x1bc   :  { %v337_v20 = vpop.f32.mrf.mxu1 }
 0x1bd   :  { %v210_v25 = vmax.f32 %v204_v21, 0.0 }
 0x1be   :  { %v206_v22 = vpop.f32.mrf.mxu1 }
 0x1bf   :  { %v207_v23 = vadd.f32 %v306_v18, %v206_v22 }
 0x1c0   :  { %v338_v24 = vpop.f32.mrf.mxu1 }
 0x1c1   :  { %v211_v26 = vmax.f32 %v207_v23, 0.0 }
 0x1c3   :  { %v212_v27 = vpack.c.bf16 %v211_v26, %v210_v25 }
 0x1c5   :  { %344 = vmatmul.mubr.msk.bf16.vlgmr.msra.gmra.mxu0 %vm93_vm1, %v212_v27 }
 0x285   :  { %v273_v29 = vpop.f32.mrf.mxu0 }
 0x286   :  { %v274_v30 = vadd.f32 %v310_v28, %v273_v29 }
 0x287   :  { %v345_v31 = vpop.f32.mrf.mxu0 }
 0x288   :  { %280 = vst [vmem:[#allocation8] sm:$0xff] %v274_v30 }
 0x289   :  { %v276_v32 = vpop.f32.mrf.mxu0 }
 0x28a   :  { %v277_v33 = vadd.f32 %v310_v28, %v276_v32 }
 0x28b   :  { %v346_v34 = vpop.f32.mrf.mxu0 }
 0x28c   :  { %281 = vst [vmem:[#allocation8 + $0x8] sm:$0xff] %v277_v33 }
 0x28d   :  { %435 = shalt.err (!%p432_p5)
}
 0x28e   :  { %s458_s15 = smov 128   ;;  %s459_s4 = smov 8  }
 0x28f   :  { %293 = dma.vmem_to_hbm [thread:$0]  %s288_s14, 256, %s519_s5, [#allocation4], %s458_s15, %s458_s15, %s459_s4  }
 0x290   :  { %448 = dma.done.wait [#allocation4], 256  }
 0x291   :  { %449 = vsyncadd [#allocation4], 4294967040 }
 0x292   :  { %297 = vsyncpa [#allocation3], 1 }
 0x293   :  { %298 = vsyncpa [#allocation6], 1 }
 0x294   :  { %299 = vsyncpa [#allocation4], 1 }

</bundles_post_ra>
